<compile_context>
chip_gen: v7x
topology: tpu7x:2x2x1
jax: 0.10.0
libtpu: 0.0.40
codegen_flags: <defaults>
</compile_context>

<pallas_src>
import math

import jax
import jax.numpy as jnp
from jax import lax
from jax.experimental import pallas as pl
from jax.experimental.pallas import tpu as pltpu


def _vmem_limit_bytes():
    """~75% of physical VMEM (v5e/v6e: 128 MiB -> ~96 MiB, v7x: 64 MiB -> ~48 MiB)."""
    try:
        cap = getattr(pltpu.get_tpu_info(), "vmem_capacity_bytes", None)
        if cap:
            return int(cap) * 3 // 4
    except Exception:
        pass
    return 48 * 1024 * 1024


_VMEM_LIMIT = _vmem_limit_bytes()


def _pick_tile(dim, candidates):
    """Largest candidate tile that evenly divides `dim`, else the full dim."""
    for c in candidates:
        if dim >= c and dim % c == 0:
            return c
    return dim


# ---------------------------------------------------------------------------
# Tiled linear:  y = x @ w.T + b     (w in PyTorch (out_dim, in_dim) layout)
# Also used for the weight-concat fused QKV projection (w = [wq*; wk; wv]).
# ---------------------------------------------------------------------------
def _linear_kernel(x_ref, w_ref, b_ref, o_ref, acc_ref):
    k = pl.program_id(2)

    @pl.when(k == 0)
    def _():
        acc_ref[...] = jnp.zeros_like(acc_ref)

    # contract last dim of x with last dim of w (no explicit transpose / XLU).
    acc_ref[...] += lax.dot_general(
        x_ref[...], w_ref[...],
        dimension_numbers=(((1,), (1,)), ((), ())),
        preferred_element_type=jnp.float32)

    @pl.when(k == pl.num_programs(2) - 1)
    def _():
        o_ref[...] = (acc_ref[...] + b_ref[...]).astype(o_ref.dtype)


def linear(x, w, b, out_dtype=jnp.float32):
    m, kd = x.shape
    n = w.shape[0]
    tm = _pick_tile(m, (512, 256, 128))
    tn = _pick_tile(n, (512, 256, 128))
    tk = _pick_tile(kd, (512, 256, 128))
    gm, gn, gk = m // tm, n // tn, kd // tk
    cost = pl.CostEstimate(
        flops=int(2 * m * n * kd),
        transcendentals=0,
        bytes_accessed=int(gn * x.size * x.dtype.itemsize        # x re-read per N tile
                           + gm * w.size * w.dtype.itemsize      # w re-read per M tile
                           + b.size * 4
                           + m * n * jnp.dtype(out_dtype).itemsize))
    return pl.pallas_call(
        _linear_kernel,
        out_shape=jax.ShapeDtypeStruct((m, n), out_dtype),
        grid=(gm, gn, gk),
        in_specs=[
            pl.BlockSpec((tm, tk), lambda i, j, k: (i, k)),
            pl.BlockSpec((tn, tk), lambda i, j, k: (j, k)),
            pl.BlockSpec((1, tn), lambda i, j, k: (0, j)),
        ],
        out_specs=pl.BlockSpec((tm, tn), lambda i, j, k: (i, j)),
        scratch_shapes=[pltpu.VMEM((tm, tn), jnp.float32)],
        compiler_params=pltpu.CompilerParams(
            dimension_semantics=("parallel", "parallel", "arbitrary"),
            vmem_limit_bytes=_VMEM_LIMIT),
        cost_estimate=cost,
    )(x, w, b.reshape(1, n).astype(jnp.float32))


# ---------------------------------------------------------------------------
# Flash-style attention on (B*H, S, head_dim) layout.
#   grid = (B*H, Sq/tq, Sk/tk); online softmax over the KV axis; scale and
#   log2(e) already folded into the Q projection -> exp2 softmax; lane-dense
#   (tq, head_dim) blocks and a single lane-dense output store per query tile.
# ---------------------------------------------------------------------------
def _mha_flash_kernel(q_ref, k_ref, v_ref, o_ref, m_sc, l_sc, acc_sc):
    ki = pl.program_id(2)

    @pl.when(ki == 0)
    def _():
        m_sc[...] = jnp.full_like(m_sc, -jnp.inf)
        l_sc[...] = jnp.zeros_like(l_sc)
        acc_sc[...] = jnp.zeros_like(acc_sc)

    q = q_ref[0]          # (tq, hd)  compute dtype (bf16); scale pre-folded
    k = k_ref[0]          # (tk, hd)
    v = v_ref[0]          # (tk, hd)

    # scores in log2 space: (Q * log2e/scale) @ K^T, contracting head_dim directly.
    s = lax.dot_general(q, k, (((1,), (1,)), ((), ())),
                        preferred_element_type=jnp.float32)      # (tq, tk) f32
    m_prev = m_sc[...]
    m_new = jnp.maximum(m_prev, jnp.max(s, axis=-1, keepdims=True))
    alpha = jnp.exp2(m_prev - m_new)
    p = jnp.exp2(s - m_new)
    l_sc[...] = alpha * l_sc[...] + jnp.sum(p, axis=-1, keepdims=True)
    acc_sc[...] = alpha * acc_sc[...] + jnp.dot(
        p.astype(v.dtype), v, preferred_element_type=jnp.float32)
    m_sc[...] = m_new
    # TODO(synk): optional attention mask (masked_fill with -inf) not implemented;
    #             this kernel covers the mask=None path. dropout=0.0 -> identity.

    @pl.when(ki == pl.num_programs(2) - 1)
    def _():
        o_ref[0] = (acc_sc[...]
                    * pl.reciprocal(l_sc[...], approx=True)).astype(o_ref.dtype)


def multi_head_attention(q, k, v):
    """q: (BH, Sq, hd), k/v: (BH, Sk, hd) -> (BH, Sq, hd). Scale folded into q."""
    BH, Sq, hd = q.shape
    Sk = k.shape[1]
    tq = _pick_tile(Sq, (512, 256, 128))
    tk = _pick_tile(Sk, (1024, 512, 256, 128))
    folds = Sq // tq
    isz = q.dtype.itemsize
    cost = pl.CostEstimate(
        flops=int(4 * BH * Sq * Sk * hd),
        transcendentals=int(BH * Sq * Sk),
        bytes_accessed=int((q.size + folds * (k.size + v.size) + q.size) * isz))
    return pl.pallas_call(
        _mha_flash_kernel,
        out_shape=jax.ShapeDtypeStruct((BH, Sq, hd), q.dtype),
        grid=(BH, Sq // tq, Sk // tk),
        in_specs=[
            pl.BlockSpec((1, tq, hd), lambda b, qi, ki: (b, qi, 0)),
            pl.BlockSpec((1, tk, hd), lambda b, qi, ki: (b, ki, 0)),
            pl.BlockSpec((1, tk, hd), lambda b, qi, ki: (b, ki, 0)),
        ],
        out_specs=pl.BlockSpec((1, tq, hd), lambda b, qi, ki: (b, qi, 0)),
        scratch_shapes=[
            pltpu.VMEM((tq, 1), jnp.float32),    # running max m
            pltpu.VMEM((tq, 1), jnp.float32),    # running denom l
            pltpu.VMEM((tq, hd), jnp.float32),   # output accumulator
        ],
        compiler_params=pltpu.CompilerParams(
            dimension_semantics=("parallel", "parallel", "arbitrary"),
            vmem_limit_bytes=_VMEM_LIMIT),
        cost_estimate=cost,
    )(q, k, v)


# ---------------------------------------------------------------------------
# Module wrapper (parameter setup + head layout plumbing)
# ---------------------------------------------------------------------------
class MultiHeadAttentionPallas:
    def __init__(self, d_model, n_heads, key, dropout=0.0, bias=True,
                 kdim=None, vdim=None, scale=None, compute_dtype=jnp.bfloat16):
        kdim = kdim if kdim is not None else d_model
        vdim = vdim if vdim is not None else d_model
        self.d_model = d_model
        self.n_heads = n_heads
        self.head_dim = d_model // n_heads
        assert self.head_dim * n_heads == d_model
        self.scale = scale if scale is not None else d_model ** 0.5
        self.compute_dtype = compute_dtype
        self.kdim, self.vdim = kdim, vdim

        ks = jax.random.split(key, 8)

        def init_linear(kw, kb, out_dim, in_dim):
            bound = 1.0 / (in_dim ** 0.5)
            w = jax.random.uniform(kw, (out_dim, in_dim), jnp.float32, -bound, bound)
            b = jax.random.uniform(kb, (out_dim,), jnp.float32, -bound, bound)
            return w, b

        self.wq, self.bq = init_linear(ks[0], ks[1], d_model, d_model)
        self.wk, self.bk = init_linear(ks[2], ks[3], d_model, kdim)
        self.wv, self.bv = init_linear(ks[4], ks[5], d_model, vdim)
        self.wo, self.bo = init_linear(ks[6], ks[7], d_model, d_model)

        cd = compute_dtype
        # Fold 1/scale AND log2(e) (exp -> exp2 conversion) into the Q projection:
        # the attention kernel then does no per-step scale multiply at all.
        qk_fold = math.log2(math.e) / self.scale
        self.wq_c = (self.wq * qk_fold).astype(cd)
        self.bq_s = self.bq * qk_fold
        self.wk_c = self.wk.astype(cd)
        self.wv_c = self.wv.astype(cd)
        self.wo_c = self.wo.astype(cd)

        # Weight-concat fused QKV: one (M,K)x(K,3D) matmul; output slices are
        # lane-aligned whenever d_model is a multiple of 128.
        self.fusable = (kdim == d_model and vdim == d_model)
        if self.fusable:
            self.w_qkv = jnp.concatenate(
                [self.wq * qk_fold, self.wk, self.wv], axis=0).astype(cd)   # (3D, D)
            self.b_qkv = jnp.concatenate([self.bq * qk_fold, self.bk, self.bv])

    def __call__(self, query, key, value, mask=None):
        if mask is not None:
            # TODO(synk): attention mask (masked_fill_ with -inf) not implemented.
            raise NotImplementedError("mask is not supported in the Pallas kernel")
        B, Sq, _ = query.shape
        Sk = key.shape[1]
        D, H, hd = self.d_model, self.n_heads, self.head_dim
        cd = self.compute_dtype

        if self.fusable and (query is key) and (key is value):
            # Self-attention: single fused projection, one read of activations.
            x = query.reshape(B * Sq, D).astype(cd)
            qkv = linear(x, self.w_qkv, self.b_qkv, out_dtype=cd)       # (B*Sq, 3D)
            Q, K, V = qkv[:, :D], qkv[:, D:2 * D], qkv[:, 2 * D:]
        else:
            Q = linear(query.reshape(B * Sq, -1).astype(cd), self.wq_c, self.bq_s, cd)
            K = linear(key.reshape(B * Sk, -1).astype(cd), self.wk_c, self.bk, cd)
            V = linear(value.reshape(B * Sk, -1).astype(cd), self.wv_c, self.bv, cd)

        # One-time layout plumbing: heads become a batch axis so the attention
        # kernel works on lane-dense (tq, head_dim) blocks (no lane slicing).
        def to_heads(t, S):
            return t.reshape(B, S, H, hd).transpose(0, 2, 1, 3).reshape(B * H, S, hd)

        x = multi_head_attention(to_heads(Q, Sq), to_heads(K, Sk), to_heads(V, Sk))
        x = x.reshape(B, H, Sq, hd).transpose(0, 2, 1, 3).reshape(B * Sq, D)

        out = linear(x, self.wo_c, self.bo, out_dtype=jnp.float32)
        return out.reshape(B, Sq, D)


# ---------------------------------------------------------------------------
def _reference(mha, query, key, value):
    """Pure-JAX f32 reference of the PyTorch forward (mask=None, dropout=0)."""
    B, Sq, _ = query.shape
    Sk = key.shape[1]
    H, hd, D = mha.n_heads, mha.head_dim, mha.d_model
    Q = query @ mha.wq.T + mha.bq
    K = key @ mha.wk.T + mha.bk
    V = value @ mha.wv.T + mha.bv
    Q = Q.reshape(B, Sq, H, hd).transpose(0, 2, 1, 3)
    K = K.reshape(B, Sk, H, hd).transpose(0, 2, 1, 3)
    V = V.reshape(B, Sk, H, hd).transpose(0, 2, 1, 3)
    energy = jnp.einsum("bhqd,bhkd->bhqk", Q, K) / mha.scale
    attn = jax.nn.softmax(energy, axis=-1)
    x = jnp.einsum("bhqk,bhkd->bhqd", attn, V)
    x = x.transpose(0, 2, 1, 3).reshape(B, Sq, D)
    return x @ mha.wo.T + mha.bo


if __name__ == "__main__":
    B, S, d_model, n_heads = 2, 8, 32, 4
    root = jax.random.PRNGKey(0)
    k_param, k_q, k_k, k_v = jax.random.split(root, 4)

    mha = MultiHeadAttentionPallas(d_model, n_heads, k_param)

    query = jax.random.normal(k_q, (B, S, d_model), jnp.float32)
    key = jax.random.normal(k_k, (B, S, d_model), jnp.float32)
    value = jax.random.normal(k_v, (B, S, d_model), jnp.float32)

    # Cross-attention path (separate per-projection pallas_calls).
    out_cross = jax.block_until_ready(mha(query, key, value))
    ref_cross = _reference(mha, query, key, value)
    assert out_cross.shape == (B, S, d_model)
    # bf16 MXU inputs with f32 accumulation -> loose tolerance vs f32 reference.
    assert jnp.allclose(out_cross, ref_cross, atol=5e-2, rtol=5e-2), \
        "cross-attention mismatch vs reference"

    # Self-attention path (weight-concat fused QKV, single projection call).
    out_self = jax.block_until_ready(mha(query, query, query))
    ref_self = _reference(mha, query, query, query)
    assert jnp.allclose(out_self, ref_self, atol=5e-2, rtol=5e-2), \
        "self-attention (fused QKV) mismatch vs reference"

    print("KERNEL_OK")
</pallas_src>

<mosaic_0001>
module attributes {stable_mosaic.version = 11 : i64} {
  func.func @_linear_kernel(%arg0: i32, %arg1: i32, %arg2: i32, %arg3: memref<16x32xbf16, #tpu.memory_space<vmem>>, %arg4: memref<32x32xbf16, #tpu.memory_space<vmem>>, %arg5: memref<1x32xf32, #tpu.memory_space<vmem>>, %arg6: memref<16x32xbf16, #tpu.memory_space<vmem>>, %arg7: memref<16x32xf32, #tpu.memory_space<vmem>>) attributes {dimension_semantics = [#tpu.dimension_semantics<parallel>, #tpu.dimension_semantics<parallel>, #tpu.dimension_semantics<arbitrary>], iteration_bounds = array<i64: 1, 1, 1>, scalar_prefetch = 0 : i64, scratch_operands = 1 : i64, tpu.core_type = #tpu.core_type<tc>, window_params = [{transform_indices = @transform_0, window_bounds = array<i64: 16, 32>}, {transform_indices = @transform_1, window_bounds = array<i64: 32, 32>}, {transform_indices = @transform_2, window_bounds = array<i64: 1, 32>}, {transform_indices = @transform_3, window_bounds = array<i64: 16, 32>}]} {
    %c0_i32 = arith.constant 0 : i32
    %0 = arith.cmpi eq, %arg2, %c0_i32 : i32
    %1 = arith.extui %0 : i1 to i32
    %c0_i32_0 = arith.constant 0 : i32
    %2 = arith.cmpi ne, %1, %c0_i32_0 : i32
    scf.if %2 {
      %cst_10 = arith.constant 0.000000e+00 : f32
      %12 = vector.broadcast %cst_10 : f32 to vector<16x32xf32>
      %c0_11 = arith.constant 0 : index
      %c0_12 = arith.constant 0 : index
      %13 = vector.load %arg7[%c0_11, %c0_12] : memref<16x32xf32, #tpu.memory_space<vmem>>, vector<16x32xf32>
      tpu.vector_store %arg7[%c0_11, %c0_12], %12 {strides = array<i32>} : memref<16x32xf32, #tpu.memory_space<vmem>>, vector<16x32xf32>,
    } else {
    }
    %c0 = arith.constant 0 : index
    %c0_1 = arith.constant 0 : index
    %3 = vector.load %arg7[%c0, %c0_1] : memref<16x32xf32, #tpu.memory_space<vmem>>, vector<16x32xf32>
    %c0_2 = arith.constant 0 : index
    %c0_3 = arith.constant 0 : index
    %4 = vector.load %arg3[%c0_2, %c0_3] : memref<16x32xbf16, #tpu.memory_space<vmem>>, vector<16x32xbf16>
    %c0_4 = arith.constant 0 : index
    %c0_5 = arith.constant 0 : index
    %5 = vector.load %arg4[%c0_4, %c0_5] : memref<32x32xbf16, #tpu.memory_space<vmem>>, vector<32x32xbf16>
    %cst = arith.constant dense<0.000000e+00> : vector<16x32xf32>
    %6 = tpu.matmul %4, %5, %cst {dimension_numbers = #tpu.dot_dimension_numbers<[1], [1], [0], [0], [0, 0, 1, 0], [], []>} : vector<16x32xbf16>, vector<32x32xbf16>, vector<16x32xf32> -> vector<16x32xf32>
    %7 = arith.addf %3, %6 : vector<16x32xf32>
    %c0_6 = arith.constant 0 : index
    %c0_7 = arith.constant 0 : index
    %8 = vector.load %arg7[%c0_6, %c0_7] : memref<16x32xf32, #tpu.memory_space<vmem>>, vector<16x32xf32>
    tpu.vector_store %arg7[%c0_6, %c0_7], %7 {strides = array<i32>} : memref<16x32xf32, #tpu.memory_space<vmem>>, vector<16x32xf32>,
    %c0_i32_8 = arith.constant 0 : i32
    %9 = arith.cmpi eq, %arg2, %c0_i32_8 : i32
    %10 = arith.extui %9 : i1 to i32
    %c0_i32_9 = arith.constant 0 : i32
    %11 = arith.cmpi ne, %10, %c0_i32_9 : i32
    scf.if %11 {
      %c0_10 = arith.constant 0 : index
      %c0_11 = arith.constant 0 : index
      %12 = vector.load %arg7[%c0_10, %c0_11] : memref<16x32xf32, #tpu.memory_space<vmem>>, vector<16x32xf32>
      %c0_12 = arith.constant 0 : index
      %c0_13 = arith.constant 0 : index
      %13 = vector.load %arg5[%c0_12, %c0_13] : memref<1x32xf32, #tpu.memory_space<vmem>>, vector<1x32xf32>
      %14 = vector.broadcast %13 : vector<1x32xf32> to vector<16x32xf32>
      %15 = arith.addf %12, %14 : vector<16x32xf32>
      %16 = arith.truncf %15 : vector<16x32xf32> to vector<16x32xbf16>
      %c0_14 = arith.constant 0 : index
      %c0_15 = arith.constant 0 : index
      %17 = vector.load %arg6[%c0_14, %c0_15] : memref<16x32xbf16, #tpu.memory_space<vmem>>, vector<16x32xbf16>
      tpu.vector_store %arg6[%c0_14, %c0_15], %16 {strides = array<i32>} : memref<16x32xbf16, #tpu.memory_space<vmem>>, vector<16x32xbf16>,
    } else {
    }
    return
  }
  func.func @transform_0(%arg0: i32, %arg1: i32, %arg2: i32) -> (i32, i32) {
    %c0_i32 = arith.constant 0 : i32
    return %arg0, %arg2 : i32, i32
  }
  func.func @transform_1(%arg0: i32, %arg1: i32, %arg2: i32) -> (i32, i32) {
    %c0_i32 = arith.constant 0 : i32
    return %arg1, %arg2 : i32, i32
  }
  func.func @transform_2(%arg0: i32, %arg1: i32, %arg2: i32) -> (i32, i32) {
    %c0_i32 = arith.constant 0 : i32
    %c0_i32_0 = arith.constant 0 : i32
    return %c0_i32, %arg1 : i32, i32
  }
  func.func @transform_3(%arg0: i32, %arg1: i32, %arg2: i32) -> (i32, i32) {
    %c0_i32 = arith.constant 0 : i32
    return %arg0, %arg1 : i32, i32
  }
}

</mosaic_0001>

<bundles_post_ra>
// kernel: tpu_custom_call.1
= control target key start
LH: loop header
LB: loop body
LE: loop exit
PB: predicated region body
PF: predicated region fallthrough
CT: control target
= control target key end

     0   :  { %8 = vsyncpa [#allocation4], 0  ;;  %s356_s0 = inlined_call_operand.hbm [shape: bf16[16,32], index: 0, kind: input, shape index: {}]   ;;  %s357_s1 = inlined_call_operand.hbm [shape: bf16[32,32], index: 1, kind: input, shape index: {}]   ;;  %s358_s2 = inlined_call_operand.vmem [shape: f32[1,32], index: 2, kind: input, shape index: {}]   ;;  %s359_s3 = inlined_call_operand.hbm [shape: bf16[16,32], index: 3, kind: output, shape index: {}]  }
   0x1   :  { %9 = vsyncpa [#allocation7], 0 }
   0x2   :  { %10 = vsyncpa [#allocation5], 0  ;;  %s274_s12 = smov [#allocation3]   ;;  %s202_s16 = scalar_lea.hbm %s356_s0, 128 }
   0x3   :  { %s16_s13 = sshll.u32 %s274_s12, 4  ;;  %p203_p0 = scmp.ne.s32.totalorder %s356_s0, %s202_s16  ;;  %s17_s13 = int_to_ptr.vmem [resolvable:$true] %s16_s13 }
   0x4   :  { %p206_p1 = scmp.lt.u32.totalorder %s202_s16, %s356_s0 }
   0x6   :  { %p208_p2 = pnand %p206_p1, %p203_p0 }
   0x8   :  { %211 = shalt.err (!%p208_p2)
}
   0x9   :  { %s212_s21 = scalar_lea.vmem %s17_s13, 128  ;;  %p217_p4 = scmp.lt.s32.totalorder %s17_s13, %s17_s13 }
   0xa   :  { %p213_p3 = scmp.ne.s32.totalorder %s17_s13, %s212_s21  ;;  %p218_p5 = scmp.lt.s32.totalorder %s212_s21, %s212_s21 }
   0xc   :  { %p219_p6 = por %p218_p5, %p217_p4 }
   0xe   :  { %p220_p7 = pnand %p219_p6, %p213_p3 }
  0x10   :  { %223 = shalt.err (!%p220_p7)
}
  0x11   :  { %s275_s22 = smov 64   ;;  %s276_s23 = smov 4  }
  0x12   :  { %22 = dma.hbm_to_vmem [thread:$0]  %s356_s0, 128, %s17_s13, [#allocation4], %s275_s22, %s275_s22, %s276_s23  }
  0x13   :  { %s277_s26 = smov [#allocation6]   ;;  %s224_s30 = scalar_lea.hbm %s357_s1, 256 }
  0x14   :  { %s28_s27 = sshll.u32 %s277_s26, 4  ;;  %p225_p8 = scmp.ne.s32.totalorder %s357_s1, %s224_s30  ;;  %s29_s27 = int_to_ptr.vmem [resolvable:$true] %s28_s27 }
  0x15   :  { %p228_p9 = scmp.lt.u32.totalorder %s224_s30, %s357_s1 }
  0x17   :  { %p230_p10 = pnand %p228_p9, %p225_p8 }
  0x19   :  { %233 = shalt.err (!%p230_p10)
}
  0x1a   :  { %s234_s8 = scalar_lea.vmem %s29_s27, 256  ;;  %p239_p12 = scmp.lt.s32.totalorder %s29_s27, %s29_s27 }
  0x1b   :  { %p235_p11 = scmp.ne.s32.totalorder %s29_s27, %s234_s8  ;;  %p240_p13 = scmp.lt.s32.totalorder %s234_s8, %s234_s8 }
  0x1d   :  { %p241_p0 = por %p240_p13, %p239_p12 }
  0x1f   :  { %p242_p1 = pnand %p241_p0, %p235_p11 }
  0x21   :  { %245 = shalt.err (!%p242_p1)
}
  0x22   :  { %34 = dma.hbm_to_vmem [thread:$0]  %s357_s1, 256, %s29_s27, [#allocation7], %s275_s22, %s275_s22, %s276_s23  }
  0x23   :  { %268 = dma.done.wait [#allocation4], 128  }
  0x24   :  { %269 = vsyncadd [#allocation4], 4294967168 }
  0x25   :  { %270 = dma.done.wait [#allocation7], 256  }
  0x26   :  { %271 = vsyncadd [#allocation7], 4294967040  ;;  %vm48_vm0 = vcmask 261120   ;;  %v278_v0 = vmov 0.0   ;;  %vm279_vm1 = vmmov 0   ;;  %v199_v1 = vld [vmem:[#allocation6] sm:$0xff]  }
  0x27   :  { %49 = vst.msk [vmem:[#allocation2] sm:$0xff] %vm48_vm0, %v278_v0  ;;  %50 = vst.msk [vmem:[#allocation2 + $0x8] sm:$0xff] %vm48_vm0, %v278_v0  ;;  %184 = vmatprep.subr.bf16.mxu0 %v278_v0  ;;  %188 = vmatprep.mubr.msk.bf16.mxu0 %vm279_vm1, %v278_v0  ;;  %v79_v2 = vsel %vm48_vm0, %v199_v1, 0  ;;  %v200_v3 = vld [vmem:[#allocation6 + $0x8] sm:$0xff]   ;;  %v201_v5 = vld [vmem:[#allocation3] sm:$0xff]   ;;  %vm151_vm2 = vcmask 257024  }
  0x28   :  { %185 = vmatpush3.bf16.xpose.msra.mxu0 %v79_v2  ;;  %v82_v4 = vsel %vm48_vm0, %v200_v3, 0  ;;  %v176_v14 = vld [vmem:[%s358_s2] ss:$0 sm:$0xff]  ;;  %s280_s11 = smov [#allocation8]  }
  0x29   :  { %186 = vmatprep.subr.bf16.mxu0 %v278_v0  ;;  %s159_s12 = sshll.u32 %s280_s11, 4  ;;  %s160_s12 = int_to_ptr.vmem [resolvable:$true] %s159_s12 }
  0x2a   :  { %s246_s13 = scalar_lea.vmem %s160_s12, 128  ;;  %p251_p3 = scmp.lt.s32.totalorder %s160_s12, %s160_s12 }
  0x2b   :  { %p247_p2 = scmp.ne.s32.totalorder %s160_s12, %s246_s13  ;;  %p252_p4 = scmp.lt.s32.totalorder %s246_s13, %s246_s13 }
  0x2d   :  { %p253_p5 = por %p252_p4, %p251_p3 }
  0x2e   :  { %v51_v6 = vld [vmem:[#allocation2] sm:$0xff]  ;;  %v52_v8 = vld [vmem:[#allocation2 + $0x8] sm:$0xff] }
  0x2f   :  { %p254_p6 = pnand %p253_p5, %p247_p2 }
  0x30   :  { %187 = vmatpush3.bf16.xpose.msra.mxu0 %v82_v4 }
  0x37   :  { %189 = vmatmul.mubr.msk.bf16.vlgmr.msra.gmra.mrb[0].mxu0 %vm48_vm0, %v201_v5 }
 0x10a   :  { %v118_v7 = vpop.f32.mrb[0].mxu0 }
 0x10b   :  { %v125_v9 = vadd.f32 %v118_v7, %v51_v6  ;;  %v190_v10 = vpop.f32.mrb[1].mxu0 }
 0x10c   :  { %v121_v11 = vpop.f32.mrb[2].mxu0 }
 0x10d   :  { %127 = vst.msk [vmem:[#allocation2] sm:$0xff] %vm48_vm0, %v125_v9  ;;  %v126_v12 = vadd.f32 %v121_v11, %v52_v8  ;;  %v191_v13 = vpop.f32.mrb[3].mxu0 }
 0x10f   :  { %128 = vst.msk [vmem:[#allocation2 + $0x8] sm:$0xff] %vm48_vm0, %v126_v12 }
 0x114   :  { %v132_v15 = vld [vmem:[#allocation2] sm:$0xff] }
 0x115   :  { %v141_v16 = vadd.f32 %v176_v14, %v132_v15 }
 0x116   :  { %v133_v17 = vld [vmem:[#allocation2 + $0x8] sm:$0xff] }
 0x117   :  { %v142_v18 = vadd.f32 %v176_v14, %v133_v17  ;;  %v179_v19 = vpack.c.bf16 %v141_v16, %v141_v16 }
 0x119   :  { %v180_v20 = vpack.c.bf16 %v142_v18, %v142_v18  ;;  %152 = vst.msk [vmem:[#allocation8] sm:$0xf] %vm151_vm2, %v179_v19 }
 0x11b   :  { %153 = vst.msk [vmem:[#allocation8 + $0x4] sm:$0xf] %vm151_vm2, %v180_v20 }
 0x11c   :  { %257 = shalt.err (!%p254_p6)
}
 0x11d   :  { %s258_s15 = scalar_lea.hbm %s359_s3, 128 }
 0x11e   :  { %p259_p7 = scmp.ne.s32.totalorder %s359_s3, %s258_s15  ;;  %p262_p8 = scmp.lt.u32.totalorder %s258_s15, %s359_s3 }
 0x120   :  { %p264_p9 = pnand %p262_p8, %p259_p7 }
 0x122   :  { %267 = shalt.err (!%p264_p9)
}
 0x123   :  { %165 = dma.vmem_to_hbm [thread:$0]  %s160_s12, 128, %s359_s3, [#allocation5], %s275_s22, %s275_s22, %s276_s23  }
 0x124   :  { %272 = dma.done.wait [#allocation5], 128  }
 0x125   :  { %273 = vsyncadd [#allocation5], 4294967168 }
 0x126   :  { %169 = vsyncpa [#allocation4], 1 }
 0x127   :  { %170 = vsyncpa [#allocation7], 1 }
 0x128   :  { %171 = vsyncpa [#allocation5], 1 }

</bundles_post_ra>
